<compile_context>
chip_gen: v5e
topology: v5e:2x2
jax: 0.10.0
libtpu: 0.0.40
codegen_flags: <defaults>
</compile_context>

<pallas_src>
import math
from functools import partial

import jax
import jax.numpy as jnp
from jax.experimental import pallas as pl
from jax.experimental.pallas import tpu as pltpu


def _flash_attn_kernel(q_ref, k_ref, v_ref, m_ref, o_ref, m_sc, l_sc, acc_sc):
    """One (G-head, q-tile, k-tile) step of online-softmax attention.

    q_ref: (G, tq, D)   k_ref/v_ref: (G, tk, D)   m_ref: (G or 1, tq, tk)
    o_ref: (G, tq, D)   scratch: m_sc/l_sc (G, tq, 1) f32, acc_sc (G, tq, D) f32
    """
    kv = pl.program_id(2)

    @pl.when(kv == 0)
    def _init():
        m_sc[...] = jnp.full(m_sc.shape, -jnp.inf, jnp.float32)
        l_sc[...] = jnp.zeros(l_sc.shape, jnp.float32)
        acc_sc[...] = jnp.zeros(acc_sc.shape, jnp.float32)

    # Pre-scale Q by 1/sqrt(d): S x D multiplies instead of S x S divides.
    scale = 1.0 / math.sqrt(q_ref.shape[-1])
    q = q_ref[...] * jnp.asarray(scale, q_ref.dtype)
    k = k_ref[...]
    v = v_ref[...]
    mask = m_ref[...].astype(jnp.float32)

    # Batched QK^T: contracts D directly (no k.T / XLU transpose), f32 accum.
    s = jnp.einsum("gqd,gkd->gqk", q, k, preferred_element_type=jnp.float32)
    s = s + mask  # mask broadcasts over G when shared across batch/heads

    # Online (streaming) softmax update.
    m_prev = m_sc[...]
    m_new = jnp.maximum(m_prev, jnp.max(s, axis=-1, keepdims=True))
    alpha = jnp.exp(m_prev - m_new)
    p = jnp.exp(s - m_new)
    l_sc[...] = alpha * l_sc[...] + jnp.sum(p, axis=-1, keepdims=True)
    acc_sc[...] = alpha * acc_sc[...] + jnp.einsum(
        "gqk,gkd->gqd", p.astype(v.dtype), v, preferred_element_type=jnp.float32
    )
    m_sc[...] = m_new

    @pl.when(kv == pl.num_programs(2) - 1)
    def _finalize():
        # Deferred normalization: S x 1 reciprocal + S x D multiply.
        inv_l = pl.reciprocal(l_sc[...], approx=False)
        o_ref[...] = (acc_sc[...] * inv_l).astype(o_ref.dtype)


def sdpa_pallas(query, key, value, attn_mask, *, block_q=None, block_k=None,
                head_group=None):
    B, H, S, D = query.shape
    BH = B * H

    # --- tile sizes (respect the (8,128) tiling constraint) -----------------
    # tk is the lane dim of the mask block -> multiple of 128 or full S.
    tk = block_k if block_k is not None else (128 if S % 128 == 0 else S)
    # tq is a sublane dim -> multiple of 8 or full S.
    tq = block_q if block_q is not None else (128 if S % 128 == 0 else S)

    # --- heads per grid step: amortize step overhead for small tiles --------
    if head_group is None:
        target = max(1, 256 // tq)
        G = 1
        for cand in range(min(BH, target), 0, -1):
            if BH % cand == 0:
                G = cand
                break
    else:
        G = head_group

    q = query.reshape(BH, S, D)
    k = key.reshape(BH, S, D)
    v = value.reshape(BH, S, D)

    # --- mask: avoid materializing a per-head broadcast in HBM --------------
    m4 = attn_mask
    while m4.ndim < 4:
        m4 = m4[None]
    Bm, Hm, Sq, Sk = m4.shape
    assert Sq == S and Sk == S
    if Bm == 1 and Hm == 1:
        # Shared across batch & heads: DMA one (tq, tk) tile, broadcast in-kernel.
        m_in = m4.reshape(1, S, S)
        m_spec = pl.BlockSpec((1, tq, tk), lambda g, qi, ki: (0, qi, ki))
    else:
        m_in = jnp.broadcast_to(m4, (B, H, S, S)).reshape(BH, S, S)
        m_spec = pl.BlockSpec((G, tq, tk), lambda g, qi, ki: (g, qi, ki))

    grid = (BH // G, S // tq, S // tk)

    out = pl.pallas_call(
        _flash_attn_kernel,
        out_shape=jax.ShapeDtypeStruct((BH, S, D), query.dtype),
        grid_spec=pltpu.PrefetchScalarGridSpec(
            num_scalar_prefetch=0,
            grid=grid,
            in_specs=[
                pl.BlockSpec((G, tq, D), lambda g, qi, ki: (g, qi, 0)),
                pl.BlockSpec((G, tk, D), lambda g, qi, ki: (g, ki, 0)),
                pl.BlockSpec((G, tk, D), lambda g, qi, ki: (g, ki, 0)),
                m_spec,
            ],
            out_specs=pl.BlockSpec((G, tq, D), lambda g, qi, ki: (g, qi, 0)),
            scratch_shapes=[
                pltpu.VMEM((G, tq, 1), jnp.float32),   # running max
                pltpu.VMEM((G, tq, 1), jnp.float32),   # running denom
                pltpu.VMEM((G, tq, D), jnp.float32),   # output accumulator
            ],
        ),
        compiler_params=pltpu.CompilerParams(
            dimension_semantics=("parallel", "parallel", "arbitrary"),
        ),
    )(q, k, v, m_in)

    return out.reshape(B, H, S, D)


def sdpa_ref(query, key, value, attn_mask):
    d = query.shape[-1]
    qk = jnp.einsum("bhqd,bhkd->bhqk", query, key) / math.sqrt(d)
    qk = qk + attn_mask
    w = jax.nn.softmax(qk, axis=-1)
    return jnp.einsum("bhqk,bhkd->bhqd", w, value)


if __name__ == "__main__":
    B, H, S, D = 2, 2, 8, 32
    key0 = jax.random.PRNGKey(0)
    kq, kk, kv, km = jax.random.split(key0, 4)

    query = jax.random.normal(kq, (B, H, S, D), dtype=jnp.float32)
    key_ = jax.random.normal(kk, (B, H, S, D), dtype=jnp.float32)
    value = jax.random.normal(kv, (B, H, S, D), dtype=jnp.float32)
    attn_mask = jax.random.normal(km, (B, H, S, S), dtype=jnp.float32)

    out = sdpa_pallas(query, key_, value, attn_mask)
    out = jax.block_until_ready(out)

    ref = sdpa_ref(query, key_, value, attn_mask)
    assert out.shape == (B, H, S, D)
    assert jnp.allclose(out, ref, atol=1e-4, rtol=1e-4), float(
        jnp.max(jnp.abs(out - ref))
    )

    print("KERNEL_OK")
</pallas_src>

<mosaic_0001>
module attributes {stable_mosaic.version = 11 : i64} {
  func.func @_flash_attn_kernel(%arg0: i32, %arg1: i32, %arg2: i32, %arg3: memref<4x8x32xf32, #tpu.memory_space<vmem>>, %arg4: memref<4x8x32xf32, #tpu.memory_space<vmem>>, %arg5: memref<4x8x32xf32, #tpu.memory_space<vmem>>, %arg6: memref<4x8x8xf32, #tpu.memory_space<vmem>>, %arg7: memref<4x8x32xf32, #tpu.memory_space<vmem>>, %arg8: memref<4x8x1xf32, #tpu.memory_space<vmem>>, %arg9: memref<4x8x1xf32, #tpu.memory_space<vmem>>, %arg10: memref<4x8x32xf32, #tpu.memory_space<vmem>>) attributes {dimension_semantics = [#tpu.dimension_semantics<parallel>, #tpu.dimension_semantics<parallel>, #tpu.dimension_semantics<arbitrary>], iteration_bounds = array<i64: 1, 1, 1>, scalar_prefetch = 0 : i64, scratch_operands = 3 : i64, tpu.core_type = #tpu.core_type<tc>, window_params = [{transform_indices = @transform_0, window_bounds = array<i64: 4, 8, 32>}, {transform_indices = @transform_1, window_bounds = array<i64: 4, 8, 32>}, {transform_indices = @transform_2, window_bounds = array<i64: 4, 8, 32>}, {transform_indices = @transform_3, window_bounds = array<i64: 4, 8, 8>}, {transform_indices = @transform_4, window_bounds = array<i64: 4, 8, 32>}]} {
    %c0_i32 = arith.constant 0 : i32
    %0 = arith.cmpi eq, %arg2, %c0_i32 : i32
    %1 = arith.extui %0 : i1 to i32
    %c0_i32_0 = arith.constant 0 : i32
    %2 = arith.cmpi ne, %1, %c0_i32_0 : i32
    scf.if %2 {
      %cst_36 = arith.constant 0xFF800000 : f32
      %36 = vector.broadcast %cst_36 : f32 to vector<4x8x1xf32>
      %c0_37 = arith.constant 0 : index
      %c0_38 = arith.constant 0 : index
      %c0_39 = arith.constant 0 : index
      %37 = vector.load %arg8[%c0_37, %c0_38, %c0_39] : memref<4x8x1xf32, #tpu.memory_space<vmem>>, vector<4x8x1xf32>
      tpu.vector_store %arg8[%c0_37, %c0_38, %c0_39], %36 {strides = array<i32>} : memref<4x8x1xf32, #tpu.memory_space<vmem>>, vector<4x8x1xf32>,
      %cst_40 = arith.constant 0.000000e+00 : f32
      %38 = vector.broadcast %cst_40 : f32 to vector<4x8x1xf32>
      %c0_41 = arith.constant 0 : index
      %c0_42 = arith.constant 0 : index
      %c0_43 = arith.constant 0 : index
      %39 = vector.load %arg9[%c0_41, %c0_42, %c0_43] : memref<4x8x1xf32, #tpu.memory_space<vmem>>, vector<4x8x1xf32>
      tpu.vector_store %arg9[%c0_41, %c0_42, %c0_43], %38 {strides = array<i32>} : memref<4x8x1xf32, #tpu.memory_space<vmem>>, vector<4x8x1xf32>,
      %cst_44 = arith.constant 0.000000e+00 : f32
      %40 = vector.broadcast %cst_44 : f32 to vector<4x8x32xf32>
      %c0_45 = arith.constant 0 : index
      %c0_46 = arith.constant 0 : index
      %c0_47 = arith.constant 0 : index
      %41 = vector.load %arg10[%c0_45, %c0_46, %c0_47] : memref<4x8x32xf32, #tpu.memory_space<vmem>>, vector<4x8x32xf32>
      tpu.vector_store %arg10[%c0_45, %c0_46, %c0_47], %40 {strides = array<i32>} : memref<4x8x32xf32, #tpu.memory_space<vmem>>, vector<4x8x32xf32>,
    } else {
    }
    %c0 = arith.constant 0 : index
    %c0_1 = arith.constant 0 : index
    %c0_2 = arith.constant 0 : index
    %3 = vector.load %arg3[%c0, %c0_1, %c0_2] : memref<4x8x32xf32, #tpu.memory_space<vmem>>, vector<4x8x32xf32>
    %cst = arith.constant 0.176776692 : f32
    %4 = vector.broadcast %cst : f32 to vector<4x8x32xf32>
    %5 = arith.mulf %3, %4 : vector<4x8x32xf32>
    %c0_3 = arith.constant 0 : index
    %c0_4 = arith.constant 0 : index
    %c0_5 = arith.constant 0 : index
    %6 = vector.load %arg4[%c0_3, %c0_4, %c0_5] : memref<4x8x32xf32, #tpu.memory_space<vmem>>, vector<4x8x32xf32>
    %c0_6 = arith.constant 0 : index
    %c0_7 = arith.constant 0 : index
    %c0_8 = arith.constant 0 : index
    %7 = vector.load %arg5[%c0_6, %c0_7, %c0_8] : memref<4x8x32xf32, #tpu.memory_space<vmem>>, vector<4x8x32xf32>
    %c0_9 = arith.constant 0 : index
    %c0_10 = arith.constant 0 : index
    %c0_11 = arith.constant 0 : index
    %8 = vector.load %arg6[%c0_9, %c0_10, %c0_11] : memref<4x8x8xf32, #tpu.memory_space<vmem>>, vector<4x8x8xf32>
    "tpu.trace_start"() <{level = 10 : i32, message = "gqd,gkd->gqk"}> : () -> ()
    %cst_12 = arith.constant dense<0.000000e+00> : vector<4x8x8xf32>
    %9 = tpu.matmul %5, %6, %cst_12 {dimension_numbers = #tpu.dot_dimension_numbers<[2], [2], [1], [1], [0, 0, 0, 1, 1, 1], [0], [0]>} : vector<4x8x32xf32>, vector<4x8x32xf32>, vector<4x8x8xf32> -> vector<4x8x8xf32>
    "tpu.trace_stop"() : () -> ()
    %10 = arith.addf %9, %8 : vector<4x8x8xf32>
    %c0_13 = arith.constant 0 : index
    %c0_14 = arith.constant 0 : index
    %c0_15 = arith.constant 0 : index
    %11 = vector.load %arg8[%c0_13, %c0_14, %c0_15] : memref<4x8x1xf32, #tpu.memory_space<vmem>>, vector<4x8x1xf32>
    %cst_16 = arith.constant dense<0xFF800000> : vector<4x8xf32>
    %12 = vector.multi_reduction <maximumf>, %10, %cst_16 [2] : vector<4x8x8xf32> to vector<4x8xf32>
    %13 = vector.shape_cast %12 : vector<4x8xf32> to vector<4x8x1xf32>
    %14 = arith.maximumf %11, %13 : vector<4x8x1xf32>
    %15 = arith.subf %11, %14 : vector<4x8x1xf32>
    %16 = math.exp %15 : vector<4x8x1xf32>
    %17 = vector.broadcast %14 : vector<4x8x1xf32> to vector<4x8x8xf32>
    %18 = arith.subf %10, %17 : vector<4x8x8xf32>
    %19 = math.exp %18 : vector<4x8x8xf32>
    %c0_17 = arith.constant 0 : index
    %c0_18 = arith.constant 0 : index
    %c0_19 = arith.constant 0 : index
    %20 = vector.load %arg9[%c0_17, %c0_18, %c0_19] : memref<4x8x1xf32, #tpu.memory_space<vmem>>, vector<4x8x1xf32>
    %21 = arith.mulf %16, %20 : vector<4x8x1xf32>
    %cst_20 = arith.constant dense<0.000000e+00> : vector<4x8xf32>
    %22 = vector.multi_reduction <add>, %19, %cst_20 [2] : vector<4x8x8xf32> to vector<4x8xf32>
    %23 = vector.shape_cast %22 : vector<4x8xf32> to vector<4x8x1xf32>
    %24 = arith.addf %21, %23 : vector<4x8x1xf32>
    %c0_21 = arith.constant 0 : index
    %c0_22 = arith.constant 0 : index
    %c0_23 = arith.constant 0 : index
    %25 = vector.load %arg9[%c0_21, %c0_22, %c0_23] : memref<4x8x1xf32, #tpu.memory_space<vmem>>, vector<4x8x1xf32>
    tpu.vector_store %arg9[%c0_21, %c0_22, %c0_23], %24 {strides = array<i32>} : memref<4x8x1xf32, #tpu.memory_space<vmem>>, vector<4x8x1xf32>,
    %c0_24 = arith.constant 0 : index
    %c0_25 = arith.constant 0 : index
    %c0_26 = arith.constant 0 : index
    %26 = vector.load %arg10[%c0_24, %c0_25, %c0_26] : memref<4x8x32xf32, #tpu.memory_space<vmem>>, vector<4x8x32xf32>
    %27 = vector.broadcast %16 : vector<4x8x1xf32> to vector<4x8x32xf32>
    %28 = arith.mulf %27, %26 : vector<4x8x32xf32>
    "tpu.trace_start"() <{level = 10 : i32, message = "gqk,gkd->gqd"}> : () -> ()
    %cst_27 = arith.constant dense<0.000000e+00> : vector<4x8x32xf32>
    %29 = tpu.matmul %19, %7, %cst_27 {dimension_numbers = #tpu.dot_dimension_numbers<[2], [1], [1], [2], [0, 0, 0, 1, 1, 2], [0], [0]>} : vector<4x8x8xf32>, vector<4x8x32xf32>, vector<4x8x32xf32> -> vector<4x8x32xf32>
    "tpu.trace_stop"() : () -> ()
    %30 = arith.addf %28, %29 : vector<4x8x32xf32>
    %c0_28 = arith.constant 0 : index
    %c0_29 = arith.constant 0 : index
    %c0_30 = arith.constant 0 : index
    %31 = vector.load %arg10[%c0_28, %c0_29, %c0_30] : memref<4x8x32xf32, #tpu.memory_space<vmem>>, vector<4x8x32xf32>
    tpu.vector_store %arg10[%c0_28, %c0_29, %c0_30], %30 {strides = array<i32>} : memref<4x8x32xf32, #tpu.memory_space<vmem>>, vector<4x8x32xf32>,
    %c0_31 = arith.constant 0 : index
    %c0_32 = arith.constant 0 : index
    %c0_33 = arith.constant 0 : index
    %32 = vector.load %arg8[%c0_31, %c0_32, %c0_33] : memref<4x8x1xf32, #tpu.memory_space<vmem>>, vector<4x8x1xf32>
    tpu.vector_store %arg8[%c0_31, %c0_32, %c0_33], %14 {strides = array<i32>} : memref<4x8x1xf32, #tpu.memory_space<vmem>>, vector<4x8x1xf32>,
    %c0_i32_34 = arith.constant 0 : i32
    %33 = arith.cmpi eq, %arg2, %c0_i32_34 : i32
    %34 = arith.extui %33 : i1 to i32
    %c0_i32_35 = arith.constant 0 : i32
    %35 = arith.cmpi ne, %34, %c0_i32_35 : i32
    scf.if %35 {
      %c0_36 = arith.constant 0 : index
      %c0_37 = arith.constant 0 : index
      %c0_38 = arith.constant 0 : index
      %36 = vector.load %arg9[%c0_36, %c0_37, %c0_38] : memref<4x8x1xf32, #tpu.memory_space<vmem>>, vector<4x8x1xf32>
      %37 = tpu.reciprocal %36 : vector<4x8x1xf32> -> vector<4x8x1xf32>
      %c0_39 = arith.constant 0 : index
      %c0_40 = arith.constant 0 : index
      %c0_41 = arith.constant 0 : index
      %38 = vector.load %arg10[%c0_39, %c0_40, %c0_41] : memref<4x8x32xf32, #tpu.memory_space<vmem>>, vector<4x8x32xf32>
      %39 = vector.broadcast %37 : vector<4x8x1xf32> to vector<4x8x32xf32>
      %40 = arith.mulf %38, %39 : vector<4x8x32xf32>
      %c0_42 = arith.constant 0 : index
      %c0_43 = arith.constant 0 : index
      %c0_44 = arith.constant 0 : index
      %41 = vector.load %arg7[%c0_42, %c0_43, %c0_44] : memref<4x8x32xf32, #tpu.memory_space<vmem>>, vector<4x8x32xf32>
      tpu.vector_store %arg7[%c0_42, %c0_43, %c0_44], %40 {strides = array<i32>} : memref<4x8x32xf32, #tpu.memory_space<vmem>>, vector<4x8x32xf32>,
    } else {
    }
    return
  }
  func.func @transform_0(%arg0: i32, %arg1: i32, %arg2: i32) -> (i32, i32, i32) {
    %c0_i32 = arith.constant 0 : i32
    %c0_i32_0 = arith.constant 0 : i32
    return %arg0, %arg1, %c0_i32 : i32, i32, i32
  }
  func.func @transform_1(%arg0: i32, %arg1: i32, %arg2: i32) -> (i32, i32, i32) {
    %c0_i32 = arith.constant 0 : i32
    %c0_i32_0 = arith.constant 0 : i32
    return %arg0, %arg2, %c0_i32 : i32, i32, i32
  }
  func.func @transform_2(%arg0: i32, %arg1: i32, %arg2: i32) -> (i32, i32, i32) {
    %c0_i32 = arith.constant 0 : i32
    %c0_i32_0 = arith.constant 0 : i32
    return %arg0, %arg2, %c0_i32 : i32, i32, i32
  }
  func.func @transform_3(%arg0: i32, %arg1: i32, %arg2: i32) -> (i32, i32, i32) {
    %c0_i32 = arith.constant 0 : i32
    return %arg0, %arg1, %arg2 : i32, i32, i32
  }
  func.func @transform_4(%arg0: i32, %arg1: i32, %arg2: i32) -> (i32, i32, i32) {
    %c0_i32 = arith.constant 0 : i32
    %c0_i32_0 = arith.constant 0 : i32
    return %arg0, %arg1, %c0_i32 : i32, i32, i32
  }
}

</mosaic_0001>

<bundles_post_ra>
// kernel: tpu_custom_call.1
= control target key start
LH: loop header
LB: loop body
LE: loop exit
PB: predicated region body
PF: predicated region fallthrough
CT: control target
= control target key end

     0   :  { %9 = vsyncpa [#allocation6], 0  ;;  %s868_s0 = inlined_call_operand.hbm [shape: f32[4,8,32], index: 0, kind: input, shape index: {}]   ;;  %s869_s1 = inlined_call_operand.hbm [shape: f32[4,8,32], index: 1, kind: input, shape index: {}]   ;;  %s870_s2 = inlined_call_operand.hbm [shape: f32[4,8,32], index: 2, kind: input, shape index: {}]   ;;  %s871_s3 = inlined_call_operand.hbm [shape: f32[4,8,8], index: 3, kind: input, shape index: {}]   ;;  %s872_s4 = inlined_call_operand.hbm [shape: f32[4,8,32], index: 4, kind: output, shape index: {}]  }
   0x1   :  { %10 = vsyncpa [#allocation9], 0 }
   0x2   :  { %11 = vsyncpa [#allocation12], 0 }
   0x3   :  { %12 = vsyncpa [#allocation7], 0  ;;  %s30_s17 = sshll.u32 %s869_s1, 4  ;;  %s743_s18 = smov [#allocation8]   ;;  %s31_s17 = int_to_ptr.hbm [resolvable:$true] %s30_s17 }
   0x4   :  { %s32_s19 = sshll.u32 %s743_s18, 4  ;;  %s17_s22 = sshll.u32 %s868_s0, 4  ;;  %s33_s19 = int_to_ptr.vmem [resolvable:$true] %s32_s19  ;;  %s18_s22 = int_to_ptr.hbm [resolvable:$true] %s17_s22 }
   0x5   :  { %s744_s23 = smov 128   ;;  %s745_s24 = smov 8  }
   0x6   :  { %38 = dma.hbm_to_vmem [thread:$0]  %s31_s17, 512, %s33_s19, [#allocation9], %s744_s23, %s744_s23, %s745_s24  }
   0x7   :  { %s746_s25 = smov [#allocation5]   ;;  %s43_s1 = sshll.u32 %s870_s2, 4  ;;  %s44_s1 = int_to_ptr.hbm [resolvable:$true] %s43_s1 }
   0x8   :  { %s19_s26 = sshll.u32 %s746_s25, 4  ;;  %s56_s30 = sshll.u32 %s871_s3, 4  ;;  %s20_s26 = int_to_ptr.vmem [resolvable:$true] %s19_s26  ;;  %s57_s30 = int_to_ptr.hbm [resolvable:$true] %s56_s30 }
   0x9   :  { %25 = dma.hbm_to_vmem [thread:$0]  %s18_s22, 512, %s20_s26, [#allocation6], %s744_s23, %s744_s23, %s745_s24  }
   0xa   :  { %s747_s5 = smov [#allocation10]   ;;  %s748_s7 = smov [#allocation11]  }
   0xb   :  { %s45_s6 = sshll.u32 %s747_s5, 4  ;;  %s58_s2 = sshll.u32 %s748_s7, 4  ;;  %s46_s6 = int_to_ptr.vmem [resolvable:$true] %s45_s6  ;;  %s59_s2 = int_to_ptr.vmem [resolvable:$true] %s58_s2 }
   0xc   :  { %51 = dma.hbm_to_vmem [thread:$0]  %s44_s1, 512, %s46_s6, [#allocation9], %s744_s23, %s744_s23, %s745_s24  }
   0xd   :  { %64 = dma.hbm_to_vmem [thread:$0]  %s57_s30, 512, %s59_s2, [#allocation12], %s744_s23, %s744_s23, %s745_s24  }
   0xe   :  { %735 = dma.done.wait [#allocation6], 512  }
   0xf   :  { %736 = vsyncadd [#allocation6], 4294966784 }
  0x10   :  { %737 = dma.done.wait [#allocation9], 1024  }
  0x11   :  { %738 = vsyncadd [#allocation9], 4294966272 }
  0x12   :  { %739 = dma.done.wait [#allocation12], 512  }
  0x13   :  { %740 = vsyncadd [#allocation12], 4294966784  ;;  %vm94_vm0 = vcmask 261120   ;;  %v107_v0 = vld [vmem:[#allocation8] sm:$0xff]  ;;  %v109_v1 = vld [vmem:[#allocation8 + $0x10] sm:$0xff]  ;;  %vm85_vm1 = vcmask 7168  }
  0x14   :  { %v99_v2 = vld [vmem:[#allocation5] sm:$0xff]  ;;  %566 = vmatpush.xpose.msk.msra.mxu0 %vm94_vm0, %v107_v0  ;;  %570 = vmatpush.xpose.msk.msra.mxu2 %vm94_vm0, %v109_v1  ;;  %v101_v4 = vld [vmem:[#allocation5 + $0x10] sm:$0xff]  ;;  %v108_v5 = vld [vmem:[#allocation8 + $0x8] sm:$0xff]  ;;  %v749_v12 = vmov -inf   ;;  %vm228_vm2 = vcmask 64512   ;;  %v750_v29 = vmov 0  }
  0x15   :  { %v103_v3 = vmul.f32 0.17677669, %v99_v2  ;;  %v110_v6 = vld [vmem:[#allocation8 + $0x18] sm:$0xff]  ;;  %v105_v7 = vmul.f32 0.17677669, %v101_v4  ;;  %568 = vmatpush.xpose.msk.msra.mxu1 %vm94_vm0, %v108_v5  ;;  %v100_v8 = vld [vmem:[#allocation5 + $0x8] sm:$0xff]  ;;  %589 = vset.pattern.permute.xlu0 %v750_v29 }
  0x16   :  { %572 = vmatpush.xpose.msk.msra.mxu3 %vm94_vm0, %v110_v6  ;;  %v102_v9 = vld [vmem:[#allocation5 + $0x18] sm:$0xff]  ;;  %v104_v10 = vmul.f32 0.17677669, %v100_v8  ;;  %86 = vst.msk [vmem:[#allocation2] sm:$0xff] %vm85_vm1, %v749_v12  ;;  %v115_v13 = vld [vmem:[#allocation11] sm:$0xff]  ;;  %v116_v16 = vld [vmem:[#allocation11 + $0x8] sm:$0xff]  ;;  %588 = vset.pattern.permute.xlu2 %v750_v29 }
  0x17   :  { %v106_v11 = vmul.f32 0.17677669, %v102_v9  ;;  %567 = vmatmul.msk.f32.vlgmr.msra.gmra.mxu0 %vm94_vm0, %v103_v3  ;;  %571 = vmatmul.msk.f32.vlgmr.msra.gmra.mxu2 %vm94_vm0, %v105_v7  ;;  %87 = vst.msk [vmem:[#allocation2 + $0x8] sm:$0xff] %vm85_vm1, %v749_v12  ;;  %v117_v19 = vld [vmem:[#allocation11 + $0x10] sm:$0xff]  ;;  %v118_v23 = vld [vmem:[#allocation11 + $0x18] sm:$0xff]  ;;  %v751_v30 = vmov 0.0  }
  0x18   :  { %569 = vmatmul.msk.f32.vlgmr.msra.gmra.mxu1 %vm94_vm0, %v104_v10  ;;  %88 = vst.msk [vmem:[#allocation2 + $0x10] sm:$0xff] %vm85_vm1, %v749_v12  ;;  %590 = vset.pattern.permute.xlu1 %v750_v29  ;;  %v113_v47 = vld [vmem:[#allocation10 + $0x10] sm:$0xff]  ;;  %v114_v48 = vld [vmem:[#allocation10 + $0x18] sm:$0xff]  ;;  %v111_v49 = vld [vmem:[#allocation10] sm:$0xff]  ;;  %s752_s3 = smov [#allocation13]   ;;  %s551_s11 = sshll.u32 %s872_s4, 4  ;;  %s552_s11 = int_to_ptr.hbm [resolvable:$true] %s551_s11 }
  0x19   :  { %573 = vmatmul.msk.f32.vlgmr.msra.gmra.mxu3 %vm94_vm0, %v106_v11  ;;  %89 = vst.msk [vmem:[#allocation2 + $0x18] sm:$0xff] %vm85_vm1, %v749_v12  ;;  %410 = vmatpush.msrb.mxu2 %v113_v47  ;;  %v112_v50 = vld [vmem:[#allocation10 + $0x8] sm:$0xff]  ;;  %s549_s8 = sshll.u32 %s752_s3, 4  ;;  %s550_s8 = int_to_ptr.vmem [resolvable:$true] %s549_s8 }
  0x1a   :  { %92 = vst.msk [vmem:[#allocation3 + $0x10] sm:$0xff] %vm85_vm1, %v751_v30  ;;  %433 = vmatpush.msrb.mxu3 %v114_v48  ;;  %364 = vmatpush.msrb.mxu0 %v111_v49 }
  0x1b   :  { %90 = vst.msk [vmem:[#allocation3] sm:$0xff] %vm85_vm1, %v751_v30  ;;  %387 = vmatpush.msrb.mxu1 %v112_v50 }
  0x1c   :  { %91 = vst.msk [vmem:[#allocation3 + $0x8] sm:$0xff] %vm85_vm1, %v751_v30 }
  0x1d   :  { %93 = vst.msk [vmem:[#allocation3 + $0x18] sm:$0xff] %vm85_vm1, %v751_v30  ;;  %v832_v31 = vld [vmem:[#allocation2] sm:$0xff] }
  0x1e   :  { %95 = vst.msk [vmem:[#allocation4] sm:$0xff] %vm94_vm0, %v751_v30  ;;  %v225_v37 = vld [vmem:[#allocation2 + $0x8] sm:$0xff] }
  0x1f   :  { %96 = vst.msk [vmem:[#allocation4 + $0x8] sm:$0xff] %vm94_vm0, %v751_v30  ;;  %v226_v35 = vld [vmem:[#allocation2 + $0x10] sm:$0xff] }
  0x20   :  { %97 = vst.msk [vmem:[#allocation4 + $0x10] sm:$0xff] %vm94_vm0, %v751_v30  ;;  %v227_v43 = vld [vmem:[#allocation2 + $0x18] sm:$0xff] }
  0x21   :  { %98 = vst.msk [vmem:[#allocation4 + $0x18] sm:$0xff] %vm94_vm0, %v751_v30 }
  0x24   :  { %v292_v29 = vld [vmem:[#allocation3 + $0x18] sm:$0xff] }
  0x94   :  { %v143_v14 = vpop.f32.mrf.mxu0 }
  0x95   :  { %v814_v15 = vadd.f32 %v143_v14, %v115_v13  ;;  %v169_v17 = vpop.f32.mrf.mxu1 }
  0x96   :  { %v818_v20 = vadd.f32 %v169_v17, %v116_v16 }
  0x97   :  { %v229_v18 = vsel %vm228_vm2, %v814_v15, -inf }
  0x98   :  { %230 = vmax.xlane.f32.xlu1 %v229_v18  ;;  %v232_v26 = vsel %vm228_vm2, %v818_v20, -inf }
  0x9a   :  { %v195_v21 = vpop.f32.mrf.mxu2 }
  0x9b   :  { %v196_v22 = vadd.f32 %v195_v21, %v117_v19 }
  0x9c   :  { %v221_v24 = vpop.f32.mrf.mxu3 }
  0x9d   :  { %v235_v25 = vsel %vm228_vm2, %v196_v22, -inf  ;;  %v222_v27 = vadd.f32 %v221_v24, %v118_v23 }
  0x9e   :  { %236 = vmax.xlane.f32.xlu0 %v235_v25 }
  0x9f   :  { %v238_v28 = vsel %vm228_vm2, %v222_v27, -inf }
  0xa0   :  { %233 = vmax.xlane.f32.xlu1 %v232_v26 }
  0xa6   :  { %239 = vmax.xlane.f32.xlu0 %v238_v28  ;;  %v290_v28 = vld [vmem:[#allocation3 + $0x8] sm:$0xff] }
 0x10b   :  { %v231_v32 = vpop.xlane.xlu1 %230 }
 0x10c   :  { %v241_v33 = vmax.f32 %v832_v31, %v231_v32 }
 0x10e   :  { %v245_v34 = vsub.f32 %v832_v31, %v241_v33  ;;  %446 = vst.msk [vmem:[#allocation2] sm:$0xff] %vm85_vm1, %v241_v33  ;;  %259 = vperm.xlu0 %589, %v241_v33  }
 0x110   :  { %v249_v7 = vmul.f32 1.442695, %v245_v34 }
 0x111   :  { %v237_v36 = vpop.xlane.xlu0 %236 }
 0x112   :  { %v243_v38 = vmax.f32 %v226_v35, %v237_v36 }
 0x113   :  { %v234_v39 = vpop.xlane.xlu1 %233 }
 0x114   :  { %v247_v40 = vsub.f32 %v226_v35, %v243_v38  ;;  %448 = vst.msk [vmem:[#allocation2 + $0x10] sm:$0xff] %vm85_vm1, %v243_v38  ;;  %v242_v41 = vmax.f32 %v225_v37, %v234_v39  ;;  %269 = vperm.xlu2 %588, %v243_v38  }
 0x116   :  { %v246_v42 = vsub.f32 %v225_v37, %v242_v41  ;;  %447 = vst.msk [vmem:[#allocation2 + $0x8] sm:$0xff] %vm85_vm1, %v242_v41  ;;  %264 = vperm.xlu1 %590, %v242_v41   ;;  %v253_v9 = vmul.f32 1.442695, %v247_v40 }
 0x118   :  { %v251_v8 = vmul.f32 1.442695, %v246_v42 }
 0x119   :  { %v240_v44 = vpop.xlane.xlu0 %239 }
 0x11a   :  { %v244_v45 = vmax.f32 %v227_v43, %v240_v44 }
 0x11c   :  { %v248_v46 = vsub.f32 %v227_v43, %v244_v45  ;;  %449 = vst.msk [vmem:[#allocation2 + $0x18] sm:$0xff] %vm85_vm1, %v244_v45  ;;  %274 = vperm.xlu2 %588, %v244_v45   ;;  %v318_v43 = vld [vmem:[#allocation4] sm:$0xff] }
 0x11e   :  { %v255_v12 = vmul.f32 1.442695, %v248_v46 }
 0x16e   :  { %v270_v51 = vpop.permute.xlu2 %269 }
 0x16f   :  { %v279_v52 = vsub.f32 %v196_v22, %v270_v51 }
 0x171   :  { %v285_v53 = vmul.f32 1.442695, %v279_v52 }
 0x173   :  { %591 = vpow2.f32 %v285_v53 }
 0x176   :  { %v275_v54 = vpop.permute.xlu2 %274 }
 0x177   :  { %v280_v55 = vsub.f32 %v222_v27, %v275_v54  ;;  %v320_v54 = vld [vmem:[#allocation4 + $0x10] sm:$0xff] }
 0x179   :  { %v592_v56 = vpop.eup %591  ;;  %v287_v57 = vmul.f32 1.442695, %v280_v55 }
 0x17a   :  { %576 = vmatmul.msk.f32.vlgmr.msrb.gmra.mxu2 %vm228_vm2, %v592_v56  ;;  %v303_v58 = vsel %vm228_vm2, %v592_v56, 0.0 }
 0x17b   :  { %593 = vpow2.f32 %v287_v57  ;;  %304 = vadd.xlane.f32.xlu0 %v303_v58 }
 0x180   :  { %v260_v59 = vpop.permute.xlu0 %259 }
 0x181   :  { %v594_v60 = vpop.eup %593  ;;  %v277_v61 = vsub.f32 %v814_v15, %v260_v59  ;;  %v291_v15 = vld [vmem:[#allocation3 + $0x10] sm:$0xff] }
 0x182   :  { %577 = vmatmul.msk.f32.vlgmr.msrb.gmra.mxu3 %vm228_vm2, %v594_v60  ;;  %v306_v6 = vsel %vm228_vm2, %v594_v60, 0.0 }
 0x183   :  { %v281_v62 = vmul.f32 1.442695, %v277_v61 }
 0x185   :  { %595 = vpow2.f32 %v281_v62 }
 0x188   :  { %v265_v63 = vpop.permute.xlu1 %264 }
 0x189   :  { %v278_v0 = vsub.f32 %v818_v20, %v265_v63  ;;  %v289_v20 = vld [vmem:[#allocation3] sm:$0xff] }
 0x18b   :  { %v596_v1 = vpop.eup %595  ;;  %v283_v2 = vmul.f32 1.442695, %v278_v0 }
 0x18c   :  { %574 = vmatmul.msk.f32.vlgmr.msrb.gmra.mxu0 %vm228_vm2, %v596_v1  ;;  %v297_v3 = vsel %vm228_vm2, %v596_v1, 0.0 }
 0x18d   :  { %597 = vpow2.f32 %v283_v2  ;;  %298 = vadd.xlane.f32.xlu2 %v297_v3 }
 0x18e   :  { %599 = vpow2.f32 %v249_v7 }
 0x18f   :  { %601 = vpow2.f32 %v251_v8  ;;  %v319_v8 = vld [vmem:[#allocation4 + $0x8] sm:$0xff] }
 0x190   :  { %603 = vpow2.f32 %v253_v9  ;;  %v321_v9 = vld [vmem:[#allocation4 + $0x18] sm:$0xff] }
 0x191   :  { %605 = vpow2.f32 %v255_v12 }
 0x193   :  { %v598_v4 = vpop.eup %597 }
 0x194   :  { %575 = vmatmul.msk.f32.vlgmr.msrb.gmra.mxu1 %vm228_vm2, %v598_v4  ;;  %v300_v5 = vsel %vm228_vm2, %v598_v4, 0.0  ;;  %v600_v10 = vpop.eup %599 }
 0x195   :  { %301 = vadd.xlane.f32.xlu1 %v300_v5  ;;  %307 = vadd.xlane.f32.xlu2 %v306_v6  ;;  %v602_v11 = vpop.eup %601  ;;  %v293_v22 = vmul.f32 %v600_v10, %v289_v20 }
 0x196   :  { %v604_v13 = vpop.eup %603  ;;  %v294_v33 = vmul.f32 %v602_v11, %v290_v28 }
 0x197   :  { %v606_v14 = vpop.eup %605  ;;  %v295_v16 = vmul.f32 %v604_v13, %v291_v15 }
 0x198   :  { %v296_v34 = vmul.f32 %v606_v14, %v292_v29 }
 0x1ad   :  { %324 = vperm.xlu2 %588, %v600_v10  }
 0x1ae   :  { %329 = vperm.xlu1 %590, %v602_v11  }
 0x1b5   :  { %334 = vperm.xlu2 %588, %v604_v13  }
 0x1bd   :  { %339 = vperm.xlu2 %588, %v606_v14  }
 0x1ee   :  { %v305_v17 = vpop.xlane.xlu0 %304 }
 0x1ef   :  { %v311_v18 = vadd.f32 %v305_v17, %v295_v16 }
 0x1f1   :  { %316 = vst.msk [vmem:[#allocation3 + $0x10] sm:$0xff] %vm85_vm1, %v311_v18 }
 0x1f8   :  { %v455_v19 = vld [vmem:[#allocation3 + $0x10] sm:$0xff] }
 0x1f9   :  { %607 = vrcp.f32 %v455_v19  ;;  %v496_v27 = vand.u32 2147483648, %v455_v19  ;;  %v494_v31 = vand.u32 2147483647, %v455_v19  ;;  %vm490_vm4 = vweird.f32 %v455_v19 }
 0x1fb   :  { %v497_v35 = vor.u32 1.1754944e-38, %v496_v27  ;;  %vm495_vm6 = vcmp.eq.f32.partialorder %v494_v31, 8.507059e+37 }
 0x1fd   :  { %v412_v63 = vpop.f32.mrf.mxu2 }
 0x1ff   :  { %v608_v21 = vpop.eup %607 }
 0x200   :  { %v299_v23 = vpop.xlane.xlu2 %298  ;;  %v486_v24 = vmul.f32 %v608_v21, %v455_v19  ;;  %vm491_vm3 = vweird.f32 %v608_v21 }
 0x201   :  { %v309_v25 = vadd.f32 %v299_v23, %v293_v22  ;;  %vm492_vm5 = vmor %vm490_vm4, %vm491_vm3 }
 0x202   :  { %v487_v26 = vsub.f32 1.0, %v486_v24 }
 0x203   :  { %314 = vst.msk [vmem:[#allocation3] sm:$0xff] %vm85_vm1, %v309_v25 }
 0x204   :  { %v488_v30 = vmul.f32 %v608_v21, %v487_v26 }
 0x205   :  { %v435_v19 = vpop.f32.mrf.mxu3 }
 0x206   :  { %v489_v32 = vadd.f32 %v608_v21, %v488_v30 }
 0x208   :  { %v302_v36 = vpop.xlane.xlu1 %301  ;;  %v308_v37 = vpop.xlane.xlu2 %307  ;;  %v493_v38 = vsel %vm492_vm5, %v608_v21, %v489_v32 }
 0x209   :  { %v310_v39 = vadd.f32 %v302_v36, %v294_v33  ;;  %v312_v40 = vadd.f32 %v308_v37, %v296_v34  ;;  %v498_v41 = vsel %vm495_vm6, %v497_v35, %v493_v38  ;;  %v366_v47 = vpop.f32.mrf.mxu0 }
 0x20a   :  { %529 = vperm.xlu1 %590, %v498_v41   ;;  %v453_v42 = vld [vmem:[#allocation3] sm:$0xff] }
 0x20b   :  { %315 = vst.msk [vmem:[#allocation3 + $0x8] sm:$0xff] %vm85_vm1, %v310_v39  ;;  %609 = vrcp.f32 %v453_v42  ;;  %v468_v53 = vand.u32 2147483648, %v453_v42  ;;  %v466_v56 = vand.u32 2147483647, %v453_v42  ;;  %vm462_vm8 = vweird.f32 %v453_v42 }
 0x20c   :  { %317 = vst.msk [vmem:[#allocation3 + $0x18] sm:$0xff] %vm85_vm1, %v312_v40 }
 0x20d   :  { %v469_v61 = vor.u32 1.1754944e-38, %v468_v53  ;;  %vm467_vm10 = vcmp.eq.f32.partialorder %v466_v56, 8.507059e+37 }
 0x210   :  { %v325_v44 = vpop.permute.xlu2 %324 }
 0x211   :  { %v610_v45 = vpop.eup %609  ;;  %v342_v46 = vmul.f32 %v325_v44, %v318_v43  ;;  %v389_v20 = vpop.f32.mrf.mxu1 }
 0x212   :  { %v458_v48 = vmul.f32 %v610_v45, %v453_v42  ;;  %v454_v49 = vld [vmem:[#allocation3 + $0x8] sm:$0xff]  ;;  %vm463_vm7 = vweird.f32 %v610_v45 }
 0x213   :  { %v438_v50 = vadd.f32 %v366_v47, %v342_v46  ;;  %611 = vrcp.f32 %v454_v49  ;;  %v456_v51 = vld [vmem:[#allocation3 + $0x18] sm:$0xff]  ;;  %vm464_vm9 = vmor %vm462_vm8, %vm463_vm7  ;;  %v482_v6 = vand.u32 2147483648, %v454_v49  ;;  %v480_v11 = vand.u32 2147483647, %v454_v49 }
 0x214   :  { %v459_v52 = vsub.f32 1.0, %v458_v48  ;;  %613 = vrcp.f32 %v456_v51  ;;  %vm476_vm12 = vweird.f32 %v454_v49  ;;  %v510_v26 = vand.u32 2147483648, %v456_v51 }
 0x215   :  { %442 = vst.msk [vmem:[#allocation4] sm:$0xff] %vm94_vm0, %v438_v50  ;;  %v483_v18 = vor.u32 1.1754944e-38, %v482_v6  ;;  %vm481_vm14 = vcmp.eq.f32.partialorder %v480_v11, 8.507059e+37  ;;  %vm504_vm1 = vweird.f32 %v456_v51  ;;  %v508_v27 = vand.u32 2147483647, %v456_v51 }
 0x216   :  { %v460_v55 = vmul.f32 %v610_v45, %v459_v52  ;;  %v511_v29 = vor.u32 1.1754944e-38, %v510_v26 }
 0x217   :  { %vm509_vm3 = vcmp.eq.f32.partialorder %v508_v27, 8.507059e+37 }
 0x218   :  { %v335_v57 = vpop.permute.xlu2 %334  ;;  %v461_v58 = vadd.f32 %v610_v45, %v460_v55 }
 0x219   :  { %v612_v59 = vpop.eup %611  ;;  %v344_v60 = vmul.f32 %v335_v57, %v320_v54 }
 0x21a   :  { %v614_v62 = vpop.eup %613  ;;  %v465_v0 = vsel %vm464_vm9, %v610_v45, %v461_v58  ;;  %v472_v1 = vmul.f32 %v612_v59, %v454_v49  ;;  %vm477_vm11 = vweird.f32 %v612_v59 }
 0x21b   :  { %v440_v2 = vadd.f32 %v412_v63, %v344_v60  ;;  %v470_v3 = vsel %vm467_vm10, %v469_v61, %v465_v0  ;;  %v500_v4 = vmul.f32 %v614_v62, %v456_v51  ;;  %vm478_vm13 = vmor %vm476_vm12, %vm477_vm11  ;;  %vm505_vm15 = vweird.f32 %v614_v62 }
 0x21c   :  { %519 = vperm.xlu0 %589, %v470_v3   ;;  %v473_v5 = vsub.f32 1.0, %v472_v1  ;;  %vm506_vm2 = vmor %vm504_vm1, %vm505_vm15  ;;  %v513_v40 = vld [vmem:[#allocation4] sm:$0xff] }
 0x21d   :  { %444 = vst.msk [vmem:[#allocation4 + $0x10] sm:$0xff] %vm94_vm0, %v440_v2  ;;  %v501_v7 = vsub.f32 1.0, %v500_v4 }
 0x21e   :  { %v474_v10 = vmul.f32 %v612_v59, %v473_v5 }
 0x21f   :  { %v502_v15 = vmul.f32 %v614_v62, %v501_v7 }
 0x220   :  { %v330_v12 = vpop.permute.xlu1 %329  ;;  %v340_v13 = vpop.permute.xlu2 %339  ;;  %v475_v14 = vadd.f32 %v612_v59, %v474_v10 }
 0x221   :  { %v343_v16 = vmul.f32 %v330_v12, %v319_v8  ;;  %v345_v17 = vmul.f32 %v340_v13, %v321_v9  ;;  %v503_v25 = vadd.f32 %v614_v62, %v502_v15 }
 0x222   :  { %v479_v21 = vsel %vm478_vm13, %v612_v59, %v475_v14 }
 0x223   :  { %v439_v22 = vadd.f32 %v389_v20, %v343_v16  ;;  %v441_v23 = vadd.f32 %v435_v19, %v345_v17  ;;  %v484_v24 = vsel %vm481_vm14, %v483_v18, %v479_v21  ;;  %v507_v28 = vsel %vm506_vm2, %v614_v62, %v503_v25 }
 0x224   :  { %524 = vperm.xlu2 %588, %v484_v24   ;;  %v512_v30 = vsel %vm509_vm3, %v511_v29, %v507_v28  ;;  %v515_v32 = vld [vmem:[#allocation4 + $0x10] sm:$0xff] }
 0x225   :  { %443 = vst.msk [vmem:[#allocation4 + $0x8] sm:$0xff] %vm94_vm0, %v439_v22 }
 0x226   :  { %445 = vst.msk [vmem:[#allocation4 + $0x18] sm:$0xff] %vm94_vm0, %v441_v23 }
 0x22c   :  { %534 = vperm.xlu2 %588, %v512_v30   ;;  %v514_v34 = vld [vmem:[#allocation4 + $0x8] sm:$0xff] }
 0x22d   :  { %v516_v37 = vld [vmem:[#allocation4 + $0x18] sm:$0xff] }
 0x27c   :  { %v530_v31 = vpop.permute.xlu1 %529 }
 0x27d   :  { %v539_v33 = vmul.f32 %v530_v31, %v515_v32 }
 0x27e   :  { %v525_v35 = vpop.permute.xlu2 %524 }
 0x27f   :  { %543 = vst.msk [vmem:[#allocation13 + $0x10] sm:$0xff] %vm94_vm0, %v539_v33  ;;  %v538_v36 = vmul.f32 %v525_v35, %v514_v34 }
 0x281   :  { %542 = vst.msk [vmem:[#allocation13 + $0x8] sm:$0xff] %vm94_vm0, %v538_v36 }
 0x286   :  { %v535_v38 = vpop.permute.xlu2 %534 }
 0x287   :  { %v540_v39 = vmul.f32 %v535_v38, %v516_v37 }
 0x289   :  { %544 = vst.msk [vmem:[#allocation13 + $0x18] sm:$0xff] %vm94_vm0, %v540_v39 }
 0x28e   :  { %v520_v41 = vpop.permute.xlu0 %519 }
 0x28f   :  { %v537_v42 = vmul.f32 %v520_v41, %v513_v40 }
 0x291   :  { %541 = vst.msk [vmem:[#allocation13] sm:$0xff] %vm94_vm0, %v537_v42 }
 0x292   :  { %557 = dma.vmem_to_hbm [thread:$0]  %s550_s8, 512, %s552_s11, [#allocation7], %s744_s23, %s744_s23, %s745_s24  }
 0x293   :  { %741 = dma.done.wait [#allocation7], 512  }
 0x294   :  { %742 = vsyncadd [#allocation7], 4294966784 }
 0x295   :  { %562 = vsyncpa [#allocation6], 1 }
 0x296   :  { %563 = vsyncpa [#allocation9], 1 }
 0x297   :  { %564 = vsyncpa [#allocation12], 1 }
 0x298   :  { %565 = vsyncpa [#allocation7], 1 }

</bundles_post_ra>
